<compile_context>
chip_gen: v6e
topology: v6e:2x2x1
jax: 0.10.0
libtpu: 0.0.40
codegen_flags: <defaults>
</compile_context>

<pallas_src>
import functools
import math

import jax
import jax.numpy as jnp
from jax.experimental import pallas as pl
from jax.experimental.pallas import tpu as pltpu


def ffm_concat3_kernel(x1_ref, x2_ref, x3_ref, s1_ref, s2_ref, s3_ref, out_ref,
                       *, c1, c2, c3):
    # Fused scale + concat: each input block is written straight into its
    # channel slice of the (1, C_all, T) output block.  All operands are
    # lane-dense along HW and stay in NCHW-flat layout: plain VPU multiplies
    # and unmasked stores (channel offsets 0, C1, C1+C2 are sublane-aligned
    # for the intended channel counts).
    out_ref[0, 0:c1, :] = (x1_ref[0] * s1_ref[...]).astype(out_ref.dtype)
    out_ref[0, c1:c1 + c2, :] = (x2_ref[0] * s2_ref[...]).astype(out_ref.dtype)
    out_ref[0, c1 + c2:c1 + c2 + c3, :] = (x3_ref[0] * s3_ref[...]).astype(out_ref.dtype)


def ffm_concat3(xs, w, *, eps=1e-4, max_hw_tile=None):
    """xs = [x1, x2, x3] with shapes (N, Ci, H, W); w has shape (C1+C2+C3,)."""
    x1, x2, x3 = xs
    N, C1, H, W = x1.shape
    N2, C2, H2, W2 = x2.shape
    N3, C3, H3, W3 = x3.shape
    assert (N, H, W) == (N2, H2, W2) == (N3, H3, W3), "spatial/batch dims must match"
    HW = H * W
    C_all = C1 + C2 + C3
    dtype = x1.dtype
    itemsize = jnp.dtype(dtype).itemsize

    # Order-preserving flat views (identical memory order to PyTorch) — free.
    x1f = x1.reshape(N, C1, HW)
    x2f = x2.reshape(N, C2, HW)
    x3f = x3.reshape(N, C3, HW)

    # ---- HW-tile selection --------------------------------------------------
    # Per-step working set ~ 2 buffers x (x block + out block + scale block)
    # ~= 6 * C_all * T * itemsize.  Budget ~24 MiB fits the scoped-VMEM default
    # on every generation (conservative for v7x's 64 MiB physical VMEM).
    if max_hw_tile is None:
        max_hw_tile = max(128, (24 << 20) // (6 * C_all * itemsize))

    if HW <= max_hw_tile:
        T = HW                                  # single tile; no periodicity needed
    else:
        # Tiled path: T must be a multiple of every Ci (single scale tile is
        # then valid for every tile) and of 128 (lane-dense stores).
        L = math.lcm(C1, C2, C3, 128)
        if L <= max_hw_tile:
            T = (max_hw_tile // L) * L
        elif L < HW:
            T = L                               # smallest valid tile (rare shapes)
        else:
            T = HW                              # no useful tiling possible
    n_t = pl.cdiv(HW, T)
    if n_t > 1:
        assert T % C1 == 0 and T % C2 == 0 and T % C3 == 0, "tile must respect channel period"

    # ---- Scale tiles: normalization folded in, fetched exactly once ----------
    w_f32 = w.astype(jnp.float32)
    weight = w_f32 / (jnp.sum(w_f32) + eps)     # hoisted out of the kernel

    def scale_tile(wi, Ci):
        # s_i[c, f] = weight_i[(c*HW + f) % Ci]  -- the .view() aliasing pattern.
        c = jnp.arange(Ci, dtype=jnp.int32)[:, None]
        f = jnp.arange(T, dtype=jnp.int32)[None, :]
        return jnp.take(wi, (c * HW + f) % Ci, axis=0).astype(dtype)

    s1 = scale_tile(weight[0:C1], C1)
    s2 = scale_tile(weight[C1:C1 + C2], C2)
    s3 = scale_tile(weight[C1 + C2:C_all], C3)

    grid = (N, n_t)  # disjoint output blocks on both axes -> both "parallel"

    cp_kwargs = dict(dimension_semantics=("parallel", "parallel"))
    vmem_need = 6 * C_all * T * itemsize
    if vmem_need > (24 << 20):                   # only when a caller forces big tiles
        cp_kwargs["vmem_limit_bytes"] = int(min(vmem_need + (8 << 20), 64 << 20))

    cost = pl.CostEstimate(
        flops=int(N * C_all * HW),
        transcendentals=0,
        bytes_accessed=int(2 * N * C_all * HW * itemsize + C_all * T * itemsize),
    )

    kernel = functools.partial(ffm_concat3_kernel, c1=C1, c2=C2, c3=C3)
    out = pl.pallas_call(
        kernel,
        out_shape=jax.ShapeDtypeStruct((N, C_all, HW), dtype),
        grid=grid,
        in_specs=[
            pl.BlockSpec((1, C1, T), lambda n, t: (n, 0, t)),   # x1
            pl.BlockSpec((1, C2, T), lambda n, t: (n, 0, t)),   # x2
            pl.BlockSpec((1, C3, T), lambda n, t: (n, 0, t)),   # x3
            pl.BlockSpec((C1, T), lambda n, t: (0, 0)),         # scale 1 (constant -> 1 DMA)
            pl.BlockSpec((C2, T), lambda n, t: (0, 0)),         # scale 2
            pl.BlockSpec((C3, T), lambda n, t: (0, 0)),         # scale 3
        ],
        out_specs=pl.BlockSpec((1, C_all, T), lambda n, t: (n, 0, t)),
        compiler_params=pltpu.CompilerParams(**cp_kwargs),
        cost_estimate=cost,
    )(x1f, x2f, x3f, s1, s2, s3)

    return out.reshape(N, C_all, H, W)


def reference_jax(xs, w, *, eps=1e-4):
    """Pure-JAX reference mirroring the PyTorch FFM_Concat3.forward exactly."""
    x1, x2, x3 = xs
    N, C1, H, W = x1.shape
    C2, C3 = x2.shape[1], x3.shape[1]
    weight = w / (jnp.sum(w) + eps)
    y1 = (weight[0:C1] * x1.reshape(N, H, W, C1)).reshape(N, C1, H, W)
    y2 = (weight[C1:C1 + C2] * x2.reshape(N, H, W, C2)).reshape(N, C2, H, W)
    y3 = (weight[C1 + C2:] * x3.reshape(N, H, W, C3)).reshape(N, C3, H, W)
    return jnp.concatenate([y1, y2, y3], axis=1)


if __name__ == "__main__":
    key = jax.random.PRNGKey(0)
    k1, k2, k3, kw, k4, k5, k6 = jax.random.split(key, 7)

    # Test 1: small shapes.  HW = 16*16 = 256 is 128-lane dense; C3 = 24 does
    # not divide 256, so the .view() channel-wrap aliasing is genuinely
    # exercised (per-channel-row scale pattern varies for x3).
    N, H, W = 2, 16, 16
    C1, C2, C3 = 8, 16, 24
    x1 = jax.random.normal(k1, (N, C1, H, W), jnp.float32)
    x2 = jax.random.normal(k2, (N, C2, H, W), jnp.float32)
    x3 = jax.random.normal(k3, (N, C3, H, W), jnp.float32)
    w = jax.random.uniform(kw, (C1 + C2 + C3,), jnp.float32, minval=0.5, maxval=1.5)

    out = jax.block_until_ready(ffm_concat3([x1, x2, x3], w))
    ref = reference_jax([x1, x2, x3], w)
    assert out.shape == (N, C1 + C2 + C3, H, W)
    assert jnp.allclose(out, ref, atol=1e-5, rtol=1e-5), "mismatch vs reference (test 1)"

    # Test 2: force the tiled path (HW = 20*20 = 400 > max_hw_tile = 384):
    # T = lcm(8,16,24,128) = 384, two HW tiles with a masked partial edge,
    # single constant-index scale tile reused by both tiles.
    Nb, Hb, Wb = 1, 20, 20
    y1 = jax.random.normal(k4, (Nb, C1, Hb, Wb), jnp.float32)
    y2 = jax.random.normal(k5, (Nb, C2, Hb, Wb), jnp.float32)
    y3 = jax.random.normal(k6, (Nb, C3, Hb, Wb), jnp.float32)
    out2 = jax.block_until_ready(ffm_concat3([y1, y2, y3], w, max_hw_tile=384))
    ref2 = reference_jax([y1, y2, y3], w)
    assert jnp.allclose(out2, ref2, atol=1e-5, rtol=1e-5), "mismatch vs reference (test 2)"

    print("KERNEL_OK")
</pallas_src>

<mosaic_0001>
module attributes {stable_mosaic.version = 11 : i64} {
  func.func @ffm_concat3_kernel(%arg0: i32, %arg1: i32, %arg2: memref<1x8x256xf32, #tpu.memory_space<vmem>>, %arg3: memref<1x16x256xf32, #tpu.memory_space<vmem>>, %arg4: memref<1x24x256xf32, #tpu.memory_space<vmem>>, %arg5: memref<8x256xf32, #tpu.memory_space<vmem>>, %arg6: memref<16x256xf32, #tpu.memory_space<vmem>>, %arg7: memref<24x256xf32, #tpu.memory_space<vmem>>, %arg8: memref<1x48x256xf32, #tpu.memory_space<vmem>>) attributes {dimension_semantics = [#tpu.dimension_semantics<parallel>, #tpu.dimension_semantics<parallel>], iteration_bounds = array<i64: 2, 1>, scalar_prefetch = 0 : i64, scratch_operands = 0 : i64, tpu.core_type = #tpu.core_type<tc>, window_params = [{transform_indices = @transform_0, window_bounds = array<i64: 1, 8, 256>}, {transform_indices = @transform_1, window_bounds = array<i64: 1, 16, 256>}, {transform_indices = @transform_2, window_bounds = array<i64: 1, 24, 256>}, {pipeline_mode = #tpu.pipeline_mode<synchronous>, transform_indices = @transform_3, window_bounds = array<i64: 8, 256>}, {pipeline_mode = #tpu.pipeline_mode<synchronous>, transform_indices = @transform_4, window_bounds = array<i64: 16, 256>}, {pipeline_mode = #tpu.pipeline_mode<synchronous>, transform_indices = @transform_5, window_bounds = array<i64: 24, 256>}, {transform_indices = @transform_6, window_bounds = array<i64: 1, 48, 256>}]} {
    %c0 = arith.constant 0 : index
    %c0_0 = arith.constant 0 : index
    %c0_1 = arith.constant 0 : index
    %0 = vector.load %arg2[%c0, %c0_0, %c0_1] : memref<1x8x256xf32, #tpu.memory_space<vmem>>, vector<1x8x256xf32>
    %1 = vector.shape_cast %0 : vector<1x8x256xf32> to vector<8x256xf32>
    %c0_2 = arith.constant 0 : index
    %c0_3 = arith.constant 0 : index
    %2 = vector.load %arg5[%c0_2, %c0_3] : memref<8x256xf32, #tpu.memory_space<vmem>>, vector<8x256xf32>
    %3 = arith.mulf %1, %2 : vector<8x256xf32>
    %c0_4 = arith.constant 0 : index
    %c0_5 = arith.constant 0 : index
    %c0_6 = arith.constant 0 : index
    %4 = vector.load %arg8[%c0_4, %c0_5, %c0_6] : memref<1x48x256xf32, #tpu.memory_space<vmem>>, vector<1x8x256xf32>
    %5 = vector.shape_cast %4 : vector<1x8x256xf32> to vector<8x256xf32>
    %6 = vector.shape_cast %3 : vector<8x256xf32> to vector<1x8x256xf32>
    tpu.vector_store %arg8[%c0_4, %c0_5, %c0_6], %6 {strides = array<i32>} : memref<1x48x256xf32, #tpu.memory_space<vmem>>, vector<1x8x256xf32>,
    %c0_7 = arith.constant 0 : index
    %c0_8 = arith.constant 0 : index
    %c0_9 = arith.constant 0 : index
    %7 = vector.load %arg3[%c0_7, %c0_8, %c0_9] : memref<1x16x256xf32, #tpu.memory_space<vmem>>, vector<1x16x256xf32>
    %8 = vector.shape_cast %7 : vector<1x16x256xf32> to vector<16x256xf32>
    %c0_10 = arith.constant 0 : index
    %c0_11 = arith.constant 0 : index
    %9 = vector.load %arg6[%c0_10, %c0_11] : memref<16x256xf32, #tpu.memory_space<vmem>>, vector<16x256xf32>
    %10 = arith.mulf %8, %9 : vector<16x256xf32>
    %c0_12 = arith.constant 0 : index
    %c8 = arith.constant 8 : index
    %c0_13 = arith.constant 0 : index
    %11 = vector.load %arg8[%c0_12, %c8, %c0_13] : memref<1x48x256xf32, #tpu.memory_space<vmem>>, vector<1x16x256xf32>
    %12 = vector.shape_cast %11 : vector<1x16x256xf32> to vector<16x256xf32>
    %13 = vector.shape_cast %10 : vector<16x256xf32> to vector<1x16x256xf32>
    tpu.vector_store %arg8[%c0_12, %c8, %c0_13], %13 {strides = array<i32>} : memref<1x48x256xf32, #tpu.memory_space<vmem>>, vector<1x16x256xf32>,
    %c0_14 = arith.constant 0 : index
    %c0_15 = arith.constant 0 : index
    %c0_16 = arith.constant 0 : index
    %14 = vector.load %arg4[%c0_14, %c0_15, %c0_16] : memref<1x24x256xf32, #tpu.memory_space<vmem>>, vector<1x24x256xf32>
    %15 = vector.shape_cast %14 : vector<1x24x256xf32> to vector<24x256xf32>
    %c0_17 = arith.constant 0 : index
    %c0_18 = arith.constant 0 : index
    %16 = vector.load %arg7[%c0_17, %c0_18] : memref<24x256xf32, #tpu.memory_space<vmem>>, vector<24x256xf32>
    %17 = arith.mulf %15, %16 : vector<24x256xf32>
    %c0_19 = arith.constant 0 : index
    %c24 = arith.constant 24 : index
    %c0_20 = arith.constant 0 : index
    %18 = vector.load %arg8[%c0_19, %c24, %c0_20] : memref<1x48x256xf32, #tpu.memory_space<vmem>>, vector<1x24x256xf32>
    %19 = vector.shape_cast %18 : vector<1x24x256xf32> to vector<24x256xf32>
    %20 = vector.shape_cast %17 : vector<24x256xf32> to vector<1x24x256xf32>
    tpu.vector_store %arg8[%c0_19, %c24, %c0_20], %20 {strides = array<i32>} : memref<1x48x256xf32, #tpu.memory_space<vmem>>, vector<1x24x256xf32>,
    return
  }
  func.func @transform_0(%arg0: i32, %arg1: i32) -> (i32, i32, i32) {
    %c0_i32 = arith.constant 0 : i32
    %c0_i32_0 = arith.constant 0 : i32
    return %arg0, %c0_i32, %arg1 : i32, i32, i32
  }
  func.func @transform_1(%arg0: i32, %arg1: i32) -> (i32, i32, i32) {
    %c0_i32 = arith.constant 0 : i32
    %c0_i32_0 = arith.constant 0 : i32
    return %arg0, %c0_i32, %arg1 : i32, i32, i32
  }
  func.func @transform_2(%arg0: i32, %arg1: i32) -> (i32, i32, i32) {
    %c0_i32 = arith.constant 0 : i32
    %c0_i32_0 = arith.constant 0 : i32
    return %arg0, %c0_i32, %arg1 : i32, i32, i32
  }
  func.func @transform_3(%arg0: i32, %arg1: i32) -> (i32, i32) {
    %c0_i32 = arith.constant 0 : i32
    %c0_i32_0 = arith.constant 0 : i32
    %c0_i32_1 = arith.constant 0 : i32
    return %c0_i32, %c0_i32_0 : i32, i32
  }
  func.func @transform_4(%arg0: i32, %arg1: i32) -> (i32, i32) {
    %c0_i32 = arith.constant 0 : i32
    %c0_i32_0 = arith.constant 0 : i32
    %c0_i32_1 = arith.constant 0 : i32
    return %c0_i32, %c0_i32_0 : i32, i32
  }
  func.func @transform_5(%arg0: i32, %arg1: i32) -> (i32, i32) {
    %c0_i32 = arith.constant 0 : i32
    %c0_i32_0 = arith.constant 0 : i32
    %c0_i32_1 = arith.constant 0 : i32
    return %c0_i32, %c0_i32_0 : i32, i32
  }
  func.func @transform_6(%arg0: i32, %arg1: i32) -> (i32, i32, i32) {
    %c0_i32 = arith.constant 0 : i32
    %c0_i32_0 = arith.constant 0 : i32
    return %arg0, %c0_i32, %arg1 : i32, i32, i32
  }
}

</mosaic_0001>

<bundles_post_ra>
// kernel: tpu_custom_call.1
= control target key start
LH: loop header
LB: loop body
LE: loop exit
PB: predicated region body
PF: predicated region fallthrough
CT: control target
= control target key end

     0   :  { %s1368_s0 = inlined_call_operand.hbm [shape: f32[2,8,256], index: 0, kind: input, shape index: {}]   ;;  %s1369_s1 = inlined_call_operand.hbm [shape: f32[2,16,256], index: 1, kind: input, shape index: {}]   ;;  %s1370_s2 = inlined_call_operand.hbm [shape: f32[2,24,256], index: 2, kind: input, shape index: {}]   ;;  %s1371_s3 = inlined_call_operand.hbm [shape: f32[8,256], index: 3, kind: input, shape index: {}]   ;;  %s1372_s4 = inlined_call_operand.hbm [shape: f32[16,256], index: 4, kind: input, shape index: {}]   ;;  %s1373_s5 = inlined_call_operand.hbm [shape: f32[24,256], index: 5, kind: input, shape index: {}]   ;;  %s1374_s6 = inlined_call_operand.hbm [shape: f32[2,48,256], index: 6, kind: output, shape index: {}]  }
   0x1   :  { %1383 = sst [smem:[#allocation23_spill]] %s1369_s1 }
   0x2   :  { %1384 = sst [smem:[#allocation24_spill]] %s1371_s3 }
   0x3   :  { %1385 = sst [smem:[#allocation25_spill]] %s1374_s6 }
   0x4   :  { %11 = vsyncpa [#allocation3], 0 }
   0x5   :  { %13 = vsyncpa [#allocation3 + $0x1], 0 }
   0x6   :  { %14 = vsyncpa [#allocation6], 0 }
   0x7   :  { %16 = vsyncpa [#allocation6 + $0x1], 0 }
   0x8   :  { %17 = vsyncpa [#allocation9], 0 }
   0x9   :  { %18 = vsyncpa [#allocation12], 0 }
   0xa   :  { %19 = vsyncpa [#allocation4], 0 }
   0xb   :  { %21 = vsyncpa [#allocation4 + $0x1], 0  ;;  %s1085_s21 = smov 0   ;;  %s1087_s22 = smov 0  }
   0xc   :  { %s1089_s23 = smov 0   ;;  %s1091_s24 = smov 0  }
   0xd   :  { %s1093_s25 = smov 0   ;;  %s1095_s26 = smov 0  }
   0xe LB: > { %1386 = sst [smem:[#allocation19_spill]] %s1017_s21  ;;  %s1116_s27 = sadd.s32 4294967295, %s1037_s26   ;;  %s1037_s26 = sphi %s1095_s26, %s27_s26   ;;  %s1033_s25 = sphi %s1093_s25, %s1416_s25   ;;  %s1029_s24 = sphi %s1091_s24, %s1415_s24   ;;  %s1025_s23 = sphi %s1089_s23, %s1414_s23   ;;  %s1021_s22 = sphi %s1087_s22, %s1413_s22   ;;  %s1017_s21 = sphi %s1085_s21, %s1412_s21  }
   0xf   : > { %s647_s28 = sadd.s32 4294967294, %s1037_s26   ;;  %s48_s29 = sadd.s32 1, %s1025_s23 }
  0x10   : > { %p55_p0 = scmp.ne.s32.totalorder %s1025_s23, %s1021_s22  ;;  %p56_p1 = scmp.eq.s32.totalorder %s1037_s26, 0 }
  0x11   : > { %p61_p2 = scmp.ne.s32.totalorder %s1021_s22, %s1017_s21  ;;  %p1375_p3 = scmp.eq.s32.totalorder %s1116_s27, 0 }
  0x12   : > { %p206_p4 = scmp.eq.s32.totalorder %s1116_s27, 1  ;;  %p1127_p5 = por %p56_p1, %p55_p0 }
  0x13   : > { %p212_p6 = scmp.eq.s32.totalorder %s647_s28, 1  ;;  %p1133_p7 = por %p1375_p3, %p61_p2 }
  0x14   : > { %p1137_p8 = por %p206_p4, %p55_p0  ;;  %p648_p10 = scmp.ge.s32.totalorder %s1037_s26, 1 }
  0x15   : > { %p1141_p9 = por %p212_p6, %p61_p2  ;;  %p219_p11 = scmp.lt.s32.totalorder %s1037_s26, 3 }
  0x16   : > { %s1389_s8 = scalar_select %p1137_p8, 1, 0 }
  0x17   : > { %s1391_s9 = scalar_select %p1141_p9, 1, 0 }
  0x18   : > { %1390 = sst [smem:[#allocation20_spill]] %s1389_s8  ;;  %p1148_p13 = pnand %p648_p10, %p219_p11 }
  0x19   : > { %1392 = sst [smem:[#allocation21_spill]] %s1391_s9  ;;  %s1039_s11 = smov [#allocation8]  }
  0x1a   : > { %s232_s12 = sshll.u32 %s1039_s11, 4  ;;  %p696_p0 = pneg %p1148_p13  ;;  %s233_s12 = int_to_ptr.vmem [resolvable:$true] %s232_s12 }
  0x1b   : > { %s39_s13 = sadd.s32 1, %s1033_s25  ;;  %p723_p4 = scmp.lt.s32.totalorder %s1037_s26, 2 }
  0x1c   : > { %p1157_p1 = pnand %p696_p0, %p1375_p3  ;;  %p1161_p2 = scmp.ge.s32.totalorder %s39_s13, 2 }
  0x1d   : > { %s1167_s16 = sand.u32 1, %s1025_s23   ;;  %s794_s17 = scalar_lea.vmem %s233_s12, 256 }
  0x1e   : > { %p785_p6 = pneg %p1157_p1  ;;  %p795_p10 = scmp.ne.s32.totalorder %s233_s12, %s794_s17 }
  0x1f   : > { %p802_p12 = scmp.lt.s32.totalorder %s233_s12, %s233_s12  ;;  %p803_p3 = scmp.lt.s32.totalorder %s794_s17, %s794_s17 }
  0x20   : > { %p797_p11 = pnand %p795_p10, %p785_p6 }
  0x21   : > { %p804_p9 = por %p803_p3, %p802_p12 }
  0x22   : > { %p798_p0 = pneg %p797_p11 }
  0x24   : > { %p805_p8 = pnand %p804_p9, %p798_p0 }
  0x26   : > { %808 = shalt.err (!%p805_p8)
}
  0x27   : > { %s1396_s3 = sld [smem:[#allocation24_spill]]  ;;  %s1418_s13 = smov (%p1161_p2, %s39_s13), 0 }
  0x28   : > { %1397 = sst [smem:[#allocation22_spill]] %s1418_s13  ;;  %p1187_p3 = pnand %p723_p4, %p1127_p5 }
  0x29   : > { %s290_s28 = sand.u32 1, %s1037_s26   ;;  %s43_s11 = ssub.s32 %s1033_s25, %s1418_s13 }
  0x2a   : > { %p46_p8 = scmp.eq.s32.totalorder %s43_s11, 0  ;;  %s656_s17 = sshll.u32 %s1167_s16, 5 }
  0x2b   : > { %s670_s18 = sshll.u32 %s1033_s25, 9  ;;  %s1399_s1 = sld [smem:[#allocation23_spill]] }
  0x2c   : > { %s1199_s19 = scalar_select %p46_p8, %s1025_s23, %s48_s29  }
  0x2d   : > { %699 = dma.hbm_to_vmem [thread:$0]  (!%p1157_p1), %s1396_s3, 256, %s233_s12, [#allocation9]  }
  0x2e   : > { %s294_s3 = scalar_lea.vmem [#allocation5], %s656_s17  ;;  %s1040_s21 = smov [#allocation10]  }
  0x2f   : > { %s303_s9 = sshll.u32 %s294_s3, 4  ;;  %s242_s6 = sshll.u32 %s1040_s21, 4  ;;  %s304_s9 = int_to_ptr.vmem [resolvable:$true] %s303_s9  ;;  %s243_s6 = int_to_ptr.vmem [resolvable:$true] %s242_s6 }
  0x30   : > { %s1204_s8 = scalar_lea.sflag [#allocation6], %s290_s28  ;;  %p811_p5 = pneg %p1187_p3 }
  0x31   : > { %s302_s30 = scalar_lea.hbm %s1399_s1, %s670_s18  ;;  %s822_s13 = scalar_lea.vmem %s304_s9, 512 }
  0x32   : > { %p823_p9 = scmp.ne.s32.totalorder %s304_s9, %s822_s13  ;;  %s1041_s29 = smov [#allocation5]  }
  0x33   : > { %s827_s11 = sshll.u32 %s1041_s29, 4  ;;  %s828_s11 = int_to_ptr.vmem [resolvable:$false] %s827_s11 }
  0x34   : > { %p825_p12 = pnand %p823_p9, %p811_p5  ;;  %s829_s12 = scalar_lea.vmem %s828_s11, 1024 }
  0x35   : > { %p830_p4 = scmp.lt.s32.totalorder %s304_s9, %s828_s11  ;;  %p831_p10 = scmp.lt.s32.totalorder %s829_s12, %s822_s13 }
  0x36   : > { %p826_p2 = pneg %p825_p12 }
  0x37   : > { %p832_p11 = por %p831_p10, %p830_p4 }
  0x39   : > { %p833_p0 = pnand %p832_p11, %p826_p2 }
  0x3b   : > { %836 = shalt.err (!%p833_p0)
}
  0x3c   : > { %s1042_s3 = smov 256   ;;  %s1043_s21 = smov 16  }
  0x3d   : > { %712 = dma.hbm_to_vmem [thread:$0]  (!%p1187_p3), %s302_s30, 512, %s304_s9, %s1204_s8, %s1042_s3, %s1042_s3, %s1043_s21  }
  0x3e   : > { %s848_s28 = scalar_lea.vmem %s243_s6, 512  ;;  %p856_p4 = scmp.lt.s32.totalorder %s243_s6, %s243_s6 }
  0x3f   : > { %p849_p8 = scmp.ne.s32.totalorder %s243_s6, %s848_s28  ;;  %p857_p2 = scmp.lt.s32.totalorder %s848_s28, %s848_s28 }
  0x41   : > { %p851_p9 = pnand %p849_p8, %p785_p6  ;;  %p858_p10 = por %p857_p2, %p856_p4 }
  0x43   : > { %p852_p12 = pneg %p851_p9 }
  0x45   : > { %p859_p11 = pnand %p858_p10, %p852_p12 }
  0x47   : > { %862 = shalt.err (!%p859_p11)
}
  0x48   : > { %702 = dma.hbm_to_vmem [thread:$0]  (!%p1157_p1), %s1372_s4, 512, %s243_s6, [#allocation9], %s1042_s3, %s1042_s3, %s1043_s21  }
  0x49   : > { %s1044_s9 = smov [#allocation11]   ;;  %s653_s15 = sshll.u32 %s1167_s16, 4 }
  0x4a   : > { %s255_s18 = sshll.u32 %s1044_s9, 4  ;;  %s256_s18 = int_to_ptr.vmem [resolvable:$true] %s255_s18 }
  0x4b   : > { %s874_s30 = scalar_lea.vmem %s256_s18, 768  ;;  %p882_p12 = scmp.lt.s32.totalorder %s256_s18, %s256_s18 }
  0x4c   : > { %p875_p0 = scmp.ne.s32.totalorder %s256_s18, %s874_s30  ;;  %p883_p4 = scmp.lt.s32.totalorder %s874_s30, %s874_s30 }
  0x4e   : > { %p877_p8 = pnand %p875_p0, %p785_p6  ;;  %p884_p2 = por %p883_p4, %p882_p12 }
  0x50   : > { %p878_p9 = pneg %p877_p8 }
  0x52   : > { %p885_p10 = pnand %p884_p2, %p878_p9 }
  0x54   : > { %888 = shalt.err (!%p885_p10)
}
  0x55   : > { %705 = dma.hbm_to_vmem [thread:$0]  (!%p1157_p1), %s1373_s5, 768, %s256_s18, [#allocation12], %s1042_s3, %s1042_s3, %s1043_s21  }
  0x56   : > { %s669_s11 = sshll.u32 %s1033_s25, 8  ;;  %s273_s17 = scalar_lea.vmem [#allocation2], %s653_s15 }
  0x57   : > { %s281_s13 = scalar_lea.hbm %s1368_s0, %s669_s11  ;;  %s283_s9 = sshll.u32 %s273_s17, 4  ;;  %s284_s9 = int_to_ptr.vmem [resolvable:$true] %s283_s9 }
  0x58   : > { %s671_s14 = smul.u32 48, %s1167_s16  ;;  %s270_s30 = scalar_lea.sflag [#allocation3], %s1167_s16 }
  0x59   : > { %s902_s1 = scalar_lea.vmem %s284_s9, 256  ;;  %s1045_s6 = smov [#allocation2]  }
  0x5a   : > { %p903_p6 = scmp.ne.s32.totalorder %s284_s9, %s902_s1  ;;  %s907_s29 = sshll.u32 %s1045_s6, 4  ;;  %s908_s29 = int_to_ptr.vmem [resolvable:$false] %s907_s29 }
  0x5b   : > { %s909_s18 = scalar_lea.vmem %s908_s29, 512  ;;  %p910_p1 = scmp.lt.s32.totalorder %s284_s9, %s908_s29 }
  0x5c   : > { %p905_p11 = pnand %p903_p6, %p811_p5  ;;  %p911_p8 = scmp.lt.s32.totalorder %s909_s18, %s902_s1 }
  0x5e   : > { %p906_p0 = pneg %p905_p11  ;;  %p912_p9 = por %p911_p8, %p910_p1 }
  0x60   : > { %p913_p12 = pnand %p912_p9, %p906_p0 }
  0x62   : > { %916 = shalt.err (!%p913_p12)
}
  0x63   : > { %709 = dma.hbm_to_vmem [thread:$0]  (!%p1187_p3), %s281_s13, 256, %s284_s9, %s270_s30  }
  0x64   : > { %s672_s16 = smul.u32 768, %s1033_s25  ;;  %s317_s15 = scalar_lea.vmem [#allocation7], %s671_s14 }
  0x65   : > { %s326_s11 = sshll.u32 %s317_s15, 4  ;;  %s1046_s1 = smov [#allocation7]   ;;  %s327_s11 = int_to_ptr.vmem [resolvable:$true] %s326_s11 }
  0x66   : > { %s325_s17 = scalar_lea.hbm %s1370_s2, %s672_s16  ;;  %s930_s6 = scalar_lea.vmem %s327_s11, 768 }
  0x67   : > { %p931_p4 = scmp.ne.s32.totalorder %s327_s11, %s930_s6  ;;  %s935_s29 = sshll.u32 %s1046_s1, 4  ;;  %s936_s29 = int_to_ptr.vmem [resolvable:$false] %s935_s29 }
  0x68   : > { %s937_s18 = scalar_lea.vmem %s936_s29, 1536  ;;  %p938_p6 = scmp.lt.s32.totalorder %s327_s11, %s936_s29 }
  0x69   : > { %p933_p2 = pnand %p931_p4, %p811_p5  ;;  %p939_p11 = scmp.lt.s32.totalorder %s937_s18, %s930_s6 }
  0x6b   : > { %p934_p10 = pneg %p933_p2  ;;  %p940_p0 = por %p939_p11, %p938_p6 }
  0x6d   : > { %p941_p1 = pnand %p940_p0, %p934_p10 }
  0x6f   : > { %944 = shalt.err (!%p941_p1)
}
  0x70   : > { %715 = dma.hbm_to_vmem [thread:$0]  (!%p1187_p3), %s325_s17, 768, %s327_s11, %s1204_s8, %s1042_s3, %s1042_s3, %s1043_s21  }
  0x71   : > { %338 = sbr.rel (%p1148_p13) target bundleno = 158 (0x9e), region = 44  ;;  %s1267_s13 = sand.u32 (!%p1148_p13), 1, %s1021_s22  }
  0x72   : > { %s661_s9 = sshll.u32 (!%p1148_p13), %s1267_s13, 4  ;;  %s341_s14 = scalar_lea.sflag (!%p1148_p13), [#allocation3], %s1267_s13 }
  0x73   : > { %s344_s30 = scalar_lea.vmem (!%p1148_p13), [#allocation2], %s661_s9 }
  0x76   : > { %996 = dma.done.wait (%p1133_p7), %s341_s14, 256  }
  0x77   : > { %998 = vsyncadd (%p1133_p7), %s341_s14, 4294967040  ;;  %s349_s8 = sand.u32 1, %s1116_s27   ;;  %s662_s10 = sshll.u32 %s1267_s13, 5 }
  0x78   : > { %s350_s20 = scalar_lea.sflag [#allocation6], %s349_s8  ;;  %s353_s3 = scalar_lea.vmem [#allocation5], %s662_s10 }
  0x79   : > { %1000 = dma.done.wait (%p1133_p7), %s350_s20, 1280  }
  0x7a   : > { %1002 = vsyncadd (%p1133_p7), %s350_s20, 4294966016  ;;  %s673_s21 = smul.u32 48, %s1267_s13  ;;  %p1400_p13 = scmp.eq.s32.totalorder %s1116_s27, 0 }
  0x7c   : > { %s1282_s16 = scalar_lea.vmem [#allocation7], %s673_s21 }
  0x7d   : > { %1004 = dma.done.wait (%p1400_p13), [#allocation9], 768   ;;  %p1401_p3 = pmov %p1400_p13 }
  0x7f   : > { %1006 = vsyncadd (%p1401_p3), [#allocation9], 4294966528  ;;  %p1402_p5 = pmov %p1401_p3 }
  0x80   : > { %p1403_p8 = pmov %p1401_p3 }
  0x81   : > { %1008 = dma.done.wait (%p1402_p5), [#allocation12], 768  }
  0x82   : > { %1010 = vsyncadd (%p1403_p8), [#allocation12], 4294966528  ;;  %s674_s15 = smul.u32 96, %s1267_s13  ;;  %v417_v0 = vld [vmem:[%s344_s30] sm:$0xff]  ;;  %v418_v2 = vld [vmem:[%s344_s30 + $0x8] sm:$0xff]  ;;  %s1405_s17 = sld [smem:[#allocation25_spill]] }
  0x83   : > { %v419_v1 = vld [vmem:[#allocation8] sm:$0xff]  ;;  %v420_v4 = vld [vmem:[#allocation8 + $0x8] sm:$0xff]  ;;  %v429_v6 = vld [vmem:[#allocation10] sm:$0xff]  ;;  %s675_s27 = smul.u32 1536, %s1029_s24  ;;  %s1404_s24 = sld [smem:[#allocation20_spill]] }
  0x84   : > { %v421_v3 = vmul.f32 %v419_v1, %v417_v0  ;;  %v425_v5 = vld [vmem:[%s353_s3] sm:$0xff]  ;;  %v422_v7 = vmul.f32 %v420_v4, %v418_v2  ;;  %v426_v9 = vld [vmem:[%s353_s3 + $0x8] sm:$0xff]  ;;  %v430_v10 = vld [vmem:[#allocation10 + $0x8] sm:$0xff]  ;;  %s1293_s7 = scalar_lea.vmem [#allocation13], %s674_s15  ;;  %s466_s1 = scalar_lea.sflag [#allocation4], %s1267_s13 }
  0x85   : > { %v433_v8 = vmul.f32 %v429_v6, %v425_v5  ;;  %v427_v11 = vld [vmem:[%s353_s3 + $0x10] sm:$0xff]  ;;  %v434_v12 = vmul.f32 %v430_v10, %v426_v9  ;;  %v431_v13 = vld [vmem:[#allocation10 + $0x10] sm:$0xff]  ;;  %v428_v14 = vld [vmem:[%s353_s3 + $0x18] sm:$0xff]  ;;  %s481_s11 = sshll.u32 %s1293_s7, 4  ;;  %s1047_s18 = smov [#allocation13]   ;;  %s1317_s11 = int_to_ptr.vmem [resolvable:$true] %s481_s11 }
  0x86   : > { %423 = vst [vmem:[%s1293_s7] sm:$0xff] %v421_v3  ;;  %v432_v15 = vld [vmem:[#allocation10 + $0x18] sm:$0xff]  ;;  %424 = vst [vmem:[%s1293_s7 + $0x8] sm:$0xff] %v422_v7  ;;  %v435_v16 = vmul.f32 %v431_v13, %v427_v11  ;;  %v441_v18 = vld [vmem:[%s1282_s16] sm:$0xff]  ;;  %s945_s29 = scalar_lea.vmem %s1317_s11, 1536  ;;  %s949_s9 = sshll.u32 %s1047_s18, 4  ;;  %s950_s9 = int_to_ptr.vmem [resolvable:$false] %s949_s9 }
  0x87   : > { %437 = vst [vmem:[%s1293_s7 + $0x10] sm:$0xff] %v433_v8  ;;  %v436_v17 = vmul.f32 %v432_v15, %v428_v14  ;;  %v447_v19 = vld [vmem:[#allocation11] sm:$0xff]  ;;  %v442_v20 = vld [vmem:[%s1282_s16 + $0x8] sm:$0xff]  ;;  %438 = vst [vmem:[%s1293_s7 + $0x18] sm:$0xff] %v434_v12  ;;  %p946_p7 = scmp.ne.s32.totalorder %s1317_s11, %s945_s29  ;;  %s951_s14 = scalar_lea.vmem %s950_s9, 3072 }
  0x88   : > { %v453_v21 = vmul.f32 %v447_v19, %v441_v18  ;;  %v448_v22 = vld [vmem:[#allocation11 + $0x8] sm:$0xff]  ;;  %v443_v23 = vld [vmem:[%s1282_s16 + $0x10] sm:$0xff]  ;;  %439 = vst [vmem:[%s1293_s7 + $0x20] sm:$0xff] %v435_v16  ;;  %v450_v28 = vld [vmem:[#allocation11 + $0x18] sm:$0xff]  ;;  %s1315_s6 = scalar_lea.hbm %s1405_s17, %s675_s27  ;;  %p952_p2 = scmp.lt.s32.totalorder %s1317_s11, %s950_s9 }
  0x89   : > { %v449_v24 = vld [vmem:[#allocation11 + $0x10] sm:$0xff]  ;;  %440 = vst [vmem:[%s1293_s7 + $0x28] sm:$0xff] %v436_v17  ;;  %v454_v25 = vmul.f32 %v448_v22, %v442_v20  ;;  %v444_v27 = vld [vmem:[%s1282_s16 + $0x18] sm:$0xff]  ;;  %v451_v31 = vld [vmem:[#allocation11 + $0x20] sm:$0xff]  ;;  %p1406_p9 = scmp.ne.s32.totalorder %s1404_s24, 0  ;;  %p953_p10 = scmp.lt.s32.totalorder %s951_s14, %s945_s29 }
  0x8a   : > { %v455_v26 = vmul.f32 %v449_v24, %v443_v23  ;;  %v445_v29 = vld [vmem:[%s1282_s16 + $0x20] sm:$0xff]  ;;  %459 = vst [vmem:[%s1293_s7 + $0x30] sm:$0xff] %v453_v21  ;;  %v456_v30 = vmul.f32 %v450_v28, %v444_v27  ;;  %v446_v32 = vld [vmem:[%s1282_s16 + $0x28] sm:$0xff] }
  0x8b   : > { %v452_v33 = vld [vmem:[#allocation11 + $0x28] sm:$0xff]  ;;  %460 = vst [vmem:[%s1293_s7 + $0x38] sm:$0xff] %v454_v25  ;;  %v457_v34 = vmul.f32 %v451_v31, %v445_v29  ;;  %p947_p12 = pnand %p946_p7, %p1406_p9  ;;  %p954_p6 = por %p953_p10, %p952_p2 }
  0x8c   : > { %461 = vst [vmem:[%s1293_s7 + $0x40] sm:$0xff] %v455_v26  ;;  %v458_v35 = vmul.f32 %v452_v33, %v446_v32  ;;  %462 = vst [vmem:[%s1293_s7 + $0x48] sm:$0xff] %v456_v30 }
  0x8d   : > { %463 = vst [vmem:[%s1293_s7 + $0x50] sm:$0xff] %v457_v34  ;;  %p948_p4 = pneg %p947_p12 }
  0x8e   : > { %464 = vst [vmem:[%s1293_s7 + $0x58] sm:$0xff] %v458_v35 }
  0x8f   : > { %p955_p11 = pnand %p954_p6, %p948_p4 }
  0x91   : > { %958 = shalt.err (!%p955_p11)
}
  0x92   : > { %s959_s30 = scalar_lea.hbm %s1315_s6, 1536  ;;  %s963_s20 = scalar_lea.hbm %s1405_s17, 3072 }
  0x93   : > { %p960_p0 = scmp.ne.s32.totalorder %s1315_s6, %s959_s30  ;;  %p964_p3 = scmp.lt.s32.totalorder %s1315_s6, %s1405_s17 }
  0x94   : > { %p965_p5 = scmp.lt.s32.totalorder %s963_s20, %s959_s30 }
  0x95   : > { %p961_p1 = pnand %p960_p0, %p1406_p9 }
  0x96   : > { %p966_p8 = por %p965_p5, %p964_p3 }
  0x97   : > { %p962_p13 = pneg %p961_p1 }
  0x99   : > { %p967_p7 = pnand %p966_p8, %p962_p13 }
  0x9b   : > { %970 = shalt.err (!%p967_p7)
}
  0x9c   : > { %s1048_s16 = smov 256   ;;  %s1049_s15 = smov 16  }
  0x9d   : > { %694 = dma.vmem_to_hbm [thread:$0]  (%p1406_p9), %s1317_s11, 1536, %s1315_s6, %s466_s1, %s1048_s16, %s1048_s16, %s1049_s15  }
  0x9e PF: > { %s1407_s7 = sld [smem:[#allocation19_spill]]  ;;  %p1410_p4 = scmp.ge.s32.totalorder %s1037_s26, 2 }
  0x9f   : > { %s1408_s27 = sld [smem:[#allocation21_spill]] }
  0xa4   : > { %s496_s12 = sand.u32 1, %s1407_s7  }
  0xa5   : > { %p1409_p12 = scmp.ne.s32.totalorder %s1408_s27, 0  ;;  %s497_s28 = scalar_lea.sflag [#allocation4], %s496_s12 }
  0xa7   : > { %p717_p2 = pnand %p1410_p4, %p1409_p12 }
  0xa9   : > { %p718_p10 = pneg %p717_p2 }
  0xab   : > { %1012 = dma.done.wait (%p718_p10), %s497_s28, 1536  }
  0xac   : > { %1014 = vsyncadd (%p718_p10), %s497_s28, 4294965760  ;;  %s27_s26 = sadd.s32 1, %s1037_s26   ;;  %s1411_s13 = sld [smem:[#allocation22_spill]] }
  0xad   : > { %p24_p6 = scmp.ge.s32.totalorder %s27_s26, 4   ;;  %s1412_s21 = smov %s1021_s22 }
  0xae   : > { %s1413_s22 = smov %s1025_s23  ;;  %s1414_s23 = smov %s1199_s19 }
  0xaf   : > { %s1415_s24 = smov %s1033_s25  ;;  %26 = sbr.rel (!%p24_p6) target bundleno = 14 (0xe), region = 125 }
  0xb2   : > { %s1416_s25 = smov %s1411_s13 }
  0xb4   :  { %502 = vsyncpa [#allocation3], 1 }
  0xb5   :  { %504 = vsyncpa [#allocation3 + $0x1], 1 }
  0xb6   :  { %505 = vsyncpa [#allocation6], 1 }
  0xb7   :  { %507 = vsyncpa [#allocation6 + $0x1], 1 }
  0xb8   :  { %508 = vsyncpa [#allocation9], 1 }
  0xb9   :  { %509 = vsyncpa [#allocation12], 1 }
  0xba   :  { %510 = vsyncpa [#allocation4], 1 }
  0xbb   :  { %512 = vsyncpa [#allocation4 + $0x1], 1 }

</bundles_post_ra>
